<compile_context>
chip_gen: v7x
topology: tpu7x:2x2x1
jax: 0.10.0
libtpu: 0.0.40
codegen_flags: <defaults>
</compile_context>

<pallas_src>
import functools

import jax
import jax.numpy as jnp
from jax.experimental import pallas as pl
from jax.experimental.pallas import tpu as pltpu


def _round_up8(n):
    return ((n + 7) // 8) * 8


def _slab_layout(embedding_dim, hidden_size, num_layers):
    """Static row offsets of each weight block inside the packed slab.

    Every block starts at a multiple of 8 rows so all in-kernel slices are
    sublane-aligned (no relayouts).
    """
    offs = []
    row = 0
    in_dim = embedding_dim
    for _ in range(num_layers):
        o_wih = row
        row += _round_up8(in_dim)
        o_whh = row
        row += _round_up8(hidden_size)
        o_b = row
        row += 8
        offs.append((o_wih, o_whh, o_b))
        in_dim = hidden_size
    o_dw = row
    row += _round_up8(hidden_size)
    o_db = row
    row += 8
    return offs, o_dw, o_db, row


# ----------------------------------------------------------------------------
# Single fused kernel: whole forward pass in one invocation (no grid).
# ----------------------------------------------------------------------------
def _fused_forward_kernel(ids_ref, emb_ref, w_ref, logits_ref, pred_ref, *,
                          num_layers, T, E, H, C, slope):
    V = emb_ref.shape[0]
    layer_offs, o_dw, o_db, _ = _slab_layout(E, H, num_layers)

    # --- Embedding lookup as a one-hot matmul (MXU); ids are SMEM scalars ---
    row_iota = jax.lax.broadcasted_iota(jnp.int32, (1, V), 1)
    onehot_rows = [(row_iota == ids_ref[t]).astype(jnp.int32) for t in range(T)]
    onehot = jnp.concatenate(onehot_rows, axis=0).astype(jnp.bfloat16)  # (T,V)
    x = jnp.dot(onehot, emb_ref[...].astype(jnp.bfloat16),
                preferred_element_type=jnp.float32)                     # (T,E)

    # --- Stacked LSTM layers (B = 1), hoisted input projection ---------------
    in_dim = E
    for l in range(num_layers):
        o_wih, o_whh, o_b = layer_offs[l]
        wih = w_ref[o_wih:o_wih + in_dim, :].astype(jnp.bfloat16)   # (in, 4H)
        whh = w_ref[o_whh:o_whh + H, :].astype(jnp.bfloat16)        # (H, 4H)
        bias = w_ref[o_b:o_b + 1, :]                                # (1, 4H) f32

        # Whole-sequence input projection: off the serial critical path.
        gx = jnp.dot(x.astype(jnp.bfloat16), wih,
                     preferred_element_type=jnp.float32) + bias     # (T, 4H)

        h = jnp.zeros((1, H), jnp.float32)
        c = jnp.zeros((1, H), jnp.float32)
        hs = []
        for t in range(T):                      # T is tiny -> static unroll
            gates = gx[t:t + 1, :] + jnp.dot(
                h.astype(jnp.bfloat16), whh,
                preferred_element_type=jnp.float32)                 # (1, 4H)
            # One full-width sigmoid; tanh(g) recovered as 2*sigmoid(2g) - 1
            # (the g-gate columns of W/b were pre-scaled by 2 on the host).
            sig = jax.nn.sigmoid(gates)
            i_g = sig[:, 0 * H:1 * H]
            f_g = sig[:, 1 * H:2 * H]
            g_g = 2.0 * sig[:, 2 * H:3 * H] - 1.0
            o_g = sig[:, 3 * H:4 * H]
            c = f_g * c + i_g * g_g
            h = o_g * jnp.tanh(c)
            hs.append(h)
        x = jnp.concatenate(hs, axis=0)                             # (T, H)
        in_dim = H

    # --- Dense + LeakyReLU + argmax, fused tail ------------------------------
    dw = w_ref[o_dw:o_dw + H, :].astype(jnp.bfloat16)   # (H,4H), cols [0,C) valid
    db = w_ref[o_db:o_db + 1, :]                        # (1,4H), cols [0,C) valid
    y = jnp.dot(x.astype(jnp.bfloat16), dw,
                preferred_element_type=jnp.float32) + db            # (T, 4H)
    y = y[:, :C]
    y = jnp.where(y >= 0.0, y, jnp.float32(slope) * y)              # LeakyReLU
    logits_ref[...] = y

    col = jax.lax.broadcasted_iota(jnp.int32, (T, C), 1)
    mx = jnp.max(y, axis=-1, keepdims=True)
    cand = jnp.where(y == mx, col, C)                   # first-index tie-break
    pred_ref[...] = jnp.min(cand, axis=-1, keepdims=True).astype(jnp.int32)


# ----------------------------------------------------------------------------
# Host-side weight packing (one slab, 8-row-aligned blocks, prescaled g gate).
# ----------------------------------------------------------------------------
def pack_params(params):
    emb = params["embedding"]
    lstm = params["lstm"]
    L = len(lstm)
    E = emb.shape[1]
    H = lstm[0]["w_hh_t"].shape[0]
    G = 4 * H
    dw = params["dense_w_t"]            # (H, C)
    db = params["dense_b"]              # (1, C)
    C = dw.shape[1]
    assert C <= G, "packed slab assumes num_classes <= 4*hidden_size"

    def prescale(w):                    # x2 on the g-gate (cell input) columns
        return w.at[..., 2 * H:3 * H].multiply(2.0)

    layer_offs, o_dw, o_db, total_rows = _slab_layout(E, H, L)
    slab = jnp.zeros((total_rows, G), jnp.float32)
    in_dim = E
    for l, layer in enumerate(lstm):
        o_wih, o_whh, o_b = layer_offs[l]
        slab = slab.at[o_wih:o_wih + in_dim, :].set(prescale(layer["w_ih_t"]))
        slab = slab.at[o_whh:o_whh + H, :].set(prescale(layer["w_hh_t"]))
        slab = slab.at[o_b:o_b + 1, :].set(prescale(layer["bias"]))
        in_dim = H
    slab = slab.at[o_dw:o_dw + H, :C].set(dw)
    slab = slab.at[o_db:o_db + 1, :C].set(db)

    return {"embedding": emb, "wslab": slab,
            "num_layers": L, "E": E, "H": H, "C": C}


# ----------------------------------------------------------------------------
# Wrapper: one pallas_call for the entire forward.
# ----------------------------------------------------------------------------
def model_forward(packed, x_ids, lrelu_slope):
    T = x_ids.shape[0]
    # Dead-batch elimination: the head reads x[:, -1, :] of a batch_first=False
    # LSTM, and batch elements never mix, so only the last batch column of the
    # token ids influences the outputs.
    ids_last = x_ids[:, -1].astype(jnp.int32)           # (T,)

    L, E, H, C = (packed["num_layers"], packed["E"], packed["H"], packed["C"])
    kernel = functools.partial(
        _fused_forward_kernel,
        num_layers=L, T=T, E=E, H=H, C=C, slope=float(lrelu_slope))

    logits, pred = pl.pallas_call(
        kernel,
        out_shape=(
            jax.ShapeDtypeStruct((T, C), jnp.float32),
            jax.ShapeDtypeStruct((T, 1), jnp.int32),
        ),
        in_specs=[
            pl.BlockSpec(memory_space=pltpu.MemorySpace.SMEM),   # token ids
            pl.BlockSpec(memory_space=pltpu.MemorySpace.VMEM),   # embedding
            pl.BlockSpec(memory_space=pltpu.MemorySpace.VMEM),   # weight slab
        ],
        out_specs=(
            pl.BlockSpec(memory_space=pltpu.MemorySpace.VMEM),
            pl.BlockSpec(memory_space=pltpu.MemorySpace.VMEM),
        ),
        compiler_params=pltpu.CompilerParams(
            vmem_limit_bytes=32 * 1024 * 1024),
    )(ids_last, packed["embedding"], packed["wslab"])

    predictions = pred[:, 0]
    # TODO(synk): nn.CrossEntropyLoss path only applies when labels are given;
    # labels=None here so loss is None (matches the reference default call).
    # Dropout is a no-op because training=False (and dropout=0 by default).
    return {"logits": logits, "loss": None, "predictions": predictions}


# ----------------------------------------------------------------------------
# Deterministic parameter construction (PyTorch-like U(-1/sqrt(H), 1/sqrt(H))).
# ----------------------------------------------------------------------------
def make_params(key, vocab_size, embedding_dim, hidden_size, num_classes,
                lstm_layers):
    keys = jax.random.split(key, 3 + 4 * lstm_layers)
    params = {}
    params["embedding"] = jax.random.normal(
        keys[0], (vocab_size, embedding_dim), jnp.float32)

    bound = 1.0 / jnp.sqrt(jnp.float32(hidden_size))
    lstm = []
    kidx = 1
    in_dim = embedding_dim
    for _ in range(lstm_layers):
        w_ih = jax.random.uniform(keys[kidx], (4 * hidden_size, in_dim),
                                  jnp.float32, -bound, bound)
        w_hh = jax.random.uniform(keys[kidx + 1], (4 * hidden_size, hidden_size),
                                  jnp.float32, -bound, bound)
        b_ih = jax.random.uniform(keys[kidx + 2], (4 * hidden_size,),
                                  jnp.float32, -bound, bound)
        b_hh = jax.random.uniform(keys[kidx + 3], (4 * hidden_size,),
                                  jnp.float32, -bound, bound)
        lstm.append({
            "w_ih_t": w_ih.T,                       # (in_dim, 4H)
            "w_hh_t": w_hh.T,                       # (H, 4H)
            "bias": (b_ih + b_hh)[None, :],         # (1, 4H)
        })
        kidx += 4
        in_dim = hidden_size
    params["lstm"] = lstm

    dbound = 1.0 / jnp.sqrt(jnp.float32(hidden_size))
    dense_w = jax.random.uniform(keys[kidx], (num_classes, hidden_size),
                                 jnp.float32, -dbound, dbound)
    dense_b = jax.random.uniform(keys[kidx + 1], (num_classes,),
                                 jnp.float32, -dbound, dbound)
    params["dense_w_t"] = dense_w.T                 # (H, C)
    params["dense_b"] = dense_b[None, :]            # (1, C)
    return params


if __name__ == "__main__":
    vocab_size = 50
    embedding_dim = 16
    num_classes = 8
    hidden_size = 32
    lstm_layers = 2
    lrelu_slope = 0.1

    key = jax.random.PRNGKey(0)
    pkey, xkey = jax.random.split(key)
    params = make_params(pkey, vocab_size, embedding_dim, hidden_size,
                         num_classes, lstm_layers)
    packed = pack_params(params)

    # Integer token ids, shape (D0=4, D1=6): dim0 = LSTM time, dim1 = batch.
    x_ids = jax.random.randint(xkey, (4, 6), 0, vocab_size, dtype=jnp.int32)

    out = model_forward(packed, x_ids, lrelu_slope)
    jax.block_until_ready(out["logits"])
    jax.block_until_ready(out["predictions"])

    assert out["logits"].shape == (4, num_classes)
    assert out["logits"].dtype == jnp.float32
    assert out["predictions"].shape == (4,)
    assert out["loss"] is None
    print("KERNEL_OK")
</pallas_src>

<mosaic_0001>
module attributes {stable_mosaic.version = 11 : i64} {
  func.func @_fused_forward_kernel(%arg0: memref<4xi32, #tpu.memory_space<smem>>, %arg1: memref<50x16xf32, #tpu.memory_space<vmem>>, %arg2: memref<168x128xf32, #tpu.memory_space<vmem>>, %arg3: memref<4x8xf32, #tpu.memory_space<vmem>>, %arg4: memref<4x1xi32, #tpu.memory_space<vmem>>) attributes {dimension_semantics = [], scalar_prefetch = 0 : i64, scratch_operands = 0 : i64, tpu.core_type = #tpu.core_type<tc>} {
    %0 = tpu.iota {dimensions = array<i32: 1>} : vector<1x50xi32>
    %c0 = arith.constant 0 : index
    %1 = memref.load %arg0[%c0] : memref<4xi32, #tpu.memory_space<smem>>
    %2 = vector.broadcast %1 : i32 to vector<1x50xi32>
    %3 = arith.cmpi eq, %0, %2 : vector<1x50xi32>
    %4 = arith.extui %3 : vector<1x50xi1> to vector<1x50xi32>
    %c1 = arith.constant 1 : index
    %5 = memref.load %arg0[%c1] : memref<4xi32, #tpu.memory_space<smem>>
    %6 = vector.broadcast %5 : i32 to vector<1x50xi32>
    %7 = arith.cmpi eq, %0, %6 : vector<1x50xi32>
    %8 = arith.extui %7 : vector<1x50xi1> to vector<1x50xi32>
    %c2 = arith.constant 2 : index
    %9 = memref.load %arg0[%c2] : memref<4xi32, #tpu.memory_space<smem>>
    %10 = vector.broadcast %9 : i32 to vector<1x50xi32>
    %11 = arith.cmpi eq, %0, %10 : vector<1x50xi32>
    %12 = arith.extui %11 : vector<1x50xi1> to vector<1x50xi32>
    %c3 = arith.constant 3 : index
    %13 = memref.load %arg0[%c3] : memref<4xi32, #tpu.memory_space<smem>>
    %14 = vector.broadcast %13 : i32 to vector<1x50xi32>
    %15 = arith.cmpi eq, %0, %14 : vector<1x50xi32>
    %16 = arith.extui %15 : vector<1x50xi1> to vector<1x50xi32>
    %17 = tpu.concatenate %4, %8, %12, %16 in 0 : vector<1x50xi32>, vector<1x50xi32>, vector<1x50xi32>, vector<1x50xi32> -> vector<4x50xi32>
    %18 = arith.sitofp %17 : vector<4x50xi32> to vector<4x50xbf16>
    %c0_0 = arith.constant 0 : index
    %c0_1 = arith.constant 0 : index
    %19 = vector.load %arg1[%c0_0, %c0_1] : memref<50x16xf32, #tpu.memory_space<vmem>>, vector<50x16xf32>
    %20 = arith.truncf %19 : vector<50x16xf32> to vector<50x16xbf16>
    %cst = arith.constant dense<0.000000e+00> : vector<4x16xf32>
    %21 = tpu.matmul %18, %20, %cst {dimension_numbers = #tpu.dot_dimension_numbers<[1], [0], [0], [1], [0, 0, 1, 1], [], []>} : vector<4x50xbf16>, vector<50x16xbf16>, vector<4x16xf32> -> vector<4x16xf32>
    %c0_2 = arith.constant 0 : index
    %c0_3 = arith.constant 0 : index
    %22 = vector.load %arg2[%c0_2, %c0_3] : memref<168x128xf32, #tpu.memory_space<vmem>>, vector<16x128xf32>
    %23 = arith.truncf %22 : vector<16x128xf32> to vector<16x128xbf16>
    %c16 = arith.constant 16 : index
    %c0_4 = arith.constant 0 : index
    %24 = vector.load %arg2[%c16, %c0_4] : memref<168x128xf32, #tpu.memory_space<vmem>>, vector<32x128xf32>
    %25 = arith.truncf %24 : vector<32x128xf32> to vector<32x128xbf16>
    %c48 = arith.constant 48 : index
    %c0_5 = arith.constant 0 : index
    %26 = vector.load %arg2[%c48, %c0_5] : memref<168x128xf32, #tpu.memory_space<vmem>>, vector<1x128xf32>
    %27 = arith.truncf %21 : vector<4x16xf32> to vector<4x16xbf16>
    %cst_6 = arith.constant dense<0.000000e+00> : vector<4x128xf32>
    %28 = tpu.matmul %27, %23, %cst_6 {dimension_numbers = #tpu.dot_dimension_numbers<[1], [0], [0], [1], [0, 0, 1, 1], [], []>} : vector<4x16xbf16>, vector<16x128xbf16>, vector<4x128xf32> -> vector<4x128xf32>
    %29 = vector.broadcast %26 : vector<1x128xf32> to vector<4x128xf32>
    %30 = arith.addf %28, %29 : vector<4x128xf32>
    %cst_7 = arith.constant 0.000000e+00 : f32
    %31 = vector.broadcast %cst_7 : f32 to vector<1x32xf32>
    %cst_8 = arith.constant 0.000000e+00 : f32
    %32 = vector.broadcast %cst_8 : f32 to vector<1x32xf32>
    %33 = vector.extract_strided_slice %30 {offsets = [0, 0], sizes = [1, 128], strides = [1, 1]} : vector<4x128xf32> to vector<1x128xf32>
    %34 = arith.truncf %31 : vector<1x32xf32> to vector<1x32xbf16>
    %cst_9 = arith.constant dense<0.000000e+00> : vector<1x128xf32>
    %35 = tpu.matmul %34, %25, %cst_9 {dimension_numbers = #tpu.dot_dimension_numbers<[1], [0], [0], [1], [0, 0, 1, 1], [], []>} : vector<1x32xbf16>, vector<32x128xbf16>, vector<1x128xf32> -> vector<1x128xf32>
    %36 = arith.addf %33, %35 : vector<1x128xf32>
    %37 = arith.negf %36 : vector<1x128xf32>
    %38 = math.exp %37 : vector<1x128xf32>
    %cst_10 = arith.constant 1.000000e+00 : f32
    %39 = vector.broadcast %cst_10 : f32 to vector<1x128xf32>
    %40 = arith.addf %39, %38 : vector<1x128xf32>
    %41 = arith.divf %39, %40 : vector<1x128xf32>
    %42 = vector.extract_strided_slice %41 {offsets = [0, 0], sizes = [1, 32], strides = [1, 1]} : vector<1x128xf32> to vector<1x32xf32>
    %43 = vector.extract_strided_slice %41 {offsets = [0, 32], sizes = [1, 32], strides = [1, 1]} : vector<1x128xf32> to vector<1x32xf32>
    %44 = vector.extract_strided_slice %41 {offsets = [0, 64], sizes = [1, 32], strides = [1, 1]} : vector<1x128xf32> to vector<1x32xf32>
    %cst_11 = arith.constant 2.000000e+00 : f32
    %45 = vector.broadcast %cst_11 : f32 to vector<1x32xf32>
    %46 = arith.mulf %45, %44 : vector<1x32xf32>
    %cst_12 = arith.constant 1.000000e+00 : f32
    %47 = vector.broadcast %cst_12 : f32 to vector<1x32xf32>
    %48 = arith.subf %46, %47 : vector<1x32xf32>
    %49 = vector.extract_strided_slice %41 {offsets = [0, 96], sizes = [1, 32], strides = [1, 1]} : vector<1x128xf32> to vector<1x32xf32>
    %50 = arith.mulf %43, %32 : vector<1x32xf32>
    %51 = arith.mulf %42, %48 : vector<1x32xf32>
    %52 = arith.addf %50, %51 : vector<1x32xf32>
    %53 = math.tanh %52 : vector<1x32xf32>
    %54 = arith.mulf %49, %53 : vector<1x32xf32>
    %55 = vector.extract_strided_slice %30 {offsets = [1, 0], sizes = [1, 128], strides = [1, 1]} : vector<4x128xf32> to vector<1x128xf32>
    %56 = arith.truncf %54 : vector<1x32xf32> to vector<1x32xbf16>
    %cst_13 = arith.constant dense<0.000000e+00> : vector<1x128xf32>
    %57 = tpu.matmul %56, %25, %cst_13 {dimension_numbers = #tpu.dot_dimension_numbers<[1], [0], [0], [1], [0, 0, 1, 1], [], []>} : vector<1x32xbf16>, vector<32x128xbf16>, vector<1x128xf32> -> vector<1x128xf32>
    %58 = arith.addf %55, %57 : vector<1x128xf32>
    %59 = arith.negf %58 : vector<1x128xf32>
    %60 = math.exp %59 : vector<1x128xf32>
    %cst_14 = arith.constant 1.000000e+00 : f32
    %61 = vector.broadcast %cst_14 : f32 to vector<1x128xf32>
    %62 = arith.addf %61, %60 : vector<1x128xf32>
    %63 = arith.divf %61, %62 : vector<1x128xf32>
    %64 = vector.extract_strided_slice %63 {offsets = [0, 0], sizes = [1, 32], strides = [1, 1]} : vector<1x128xf32> to vector<1x32xf32>
    %65 = vector.extract_strided_slice %63 {offsets = [0, 32], sizes = [1, 32], strides = [1, 1]} : vector<1x128xf32> to vector<1x32xf32>
    %66 = vector.extract_strided_slice %63 {offsets = [0, 64], sizes = [1, 32], strides = [1, 1]} : vector<1x128xf32> to vector<1x32xf32>
    %cst_15 = arith.constant 2.000000e+00 : f32
    %67 = vector.broadcast %cst_15 : f32 to vector<1x32xf32>
    %68 = arith.mulf %67, %66 : vector<1x32xf32>
    %cst_16 = arith.constant 1.000000e+00 : f32
    %69 = vector.broadcast %cst_16 : f32 to vector<1x32xf32>
    %70 = arith.subf %68, %69 : vector<1x32xf32>
    %71 = vector.extract_strided_slice %63 {offsets = [0, 96], sizes = [1, 32], strides = [1, 1]} : vector<1x128xf32> to vector<1x32xf32>
    %72 = arith.mulf %65, %52 : vector<1x32xf32>
    %73 = arith.mulf %64, %70 : vector<1x32xf32>
    %74 = arith.addf %72, %73 : vector<1x32xf32>
    %75 = math.tanh %74 : vector<1x32xf32>
    %76 = arith.mulf %71, %75 : vector<1x32xf32>
    %77 = vector.extract_strided_slice %30 {offsets = [2, 0], sizes = [1, 128], strides = [1, 1]} : vector<4x128xf32> to vector<1x128xf32>
    %78 = arith.truncf %76 : vector<1x32xf32> to vector<1x32xbf16>
    %cst_17 = arith.constant dense<0.000000e+00> : vector<1x128xf32>
    %79 = tpu.matmul %78, %25, %cst_17 {dimension_numbers = #tpu.dot_dimension_numbers<[1], [0], [0], [1], [0, 0, 1, 1], [], []>} : vector<1x32xbf16>, vector<32x128xbf16>, vector<1x128xf32> -> vector<1x128xf32>
    %80 = arith.addf %77, %79 : vector<1x128xf32>
    %81 = arith.negf %80 : vector<1x128xf32>
    %82 = math.exp %81 : vector<1x128xf32>
    %cst_18 = arith.constant 1.000000e+00 : f32
    %83 = vector.broadcast %cst_18 : f32 to vector<1x128xf32>
    %84 = arith.addf %83, %82 : vector<1x128xf32>
    %85 = arith.divf %83, %84 : vector<1x128xf32>
    %86 = vector.extract_strided_slice %85 {offsets = [0, 0], sizes = [1, 32], strides = [1, 1]} : vector<1x128xf32> to vector<1x32xf32>
    %87 = vector.extract_strided_slice %85 {offsets = [0, 32], sizes = [1, 32], strides = [1, 1]} : vector<1x128xf32> to vector<1x32xf32>
    %88 = vector.extract_strided_slice %85 {offsets = [0, 64], sizes = [1, 32], strides = [1, 1]} : vector<1x128xf32> to vector<1x32xf32>
    %cst_19 = arith.constant 2.000000e+00 : f32
    %89 = vector.broadcast %cst_19 : f32 to vector<1x32xf32>
    %90 = arith.mulf %89, %88 : vector<1x32xf32>
    %cst_20 = arith.constant 1.000000e+00 : f32
    %91 = vector.broadcast %cst_20 : f32 to vector<1x32xf32>
    %92 = arith.subf %90, %91 : vector<1x32xf32>
    %93 = vector.extract_strided_slice %85 {offsets = [0, 96], sizes = [1, 32], strides = [1, 1]} : vector<1x128xf32> to vector<1x32xf32>
    %94 = arith.mulf %87, %74 : vector<1x32xf32>
    %95 = arith.mulf %86, %92 : vector<1x32xf32>
    %96 = arith.addf %94, %95 : vector<1x32xf32>
    %97 = math.tanh %96 : vector<1x32xf32>
    %98 = arith.mulf %93, %97 : vector<1x32xf32>
    %99 = vector.extract_strided_slice %30 {offsets = [3, 0], sizes = [1, 128], strides = [1, 1]} : vector<4x128xf32> to vector<1x128xf32>
    %100 = arith.truncf %98 : vector<1x32xf32> to vector<1x32xbf16>
    %cst_21 = arith.constant dense<0.000000e+00> : vector<1x128xf32>
    %101 = tpu.matmul %100, %25, %cst_21 {dimension_numbers = #tpu.dot_dimension_numbers<[1], [0], [0], [1], [0, 0, 1, 1], [], []>} : vector<1x32xbf16>, vector<32x128xbf16>, vector<1x128xf32> -> vector<1x128xf32>
    %102 = arith.addf %99, %101 : vector<1x128xf32>
    %103 = arith.negf %102 : vector<1x128xf32>
    %104 = math.exp %103 : vector<1x128xf32>
    %cst_22 = arith.constant 1.000000e+00 : f32
    %105 = vector.broadcast %cst_22 : f32 to vector<1x128xf32>
    %106 = arith.addf %105, %104 : vector<1x128xf32>
    %107 = arith.divf %105, %106 : vector<1x128xf32>
    %108 = vector.extract_strided_slice %107 {offsets = [0, 0], sizes = [1, 32], strides = [1, 1]} : vector<1x128xf32> to vector<1x32xf32>
    %109 = vector.extract_strided_slice %107 {offsets = [0, 32], sizes = [1, 32], strides = [1, 1]} : vector<1x128xf32> to vector<1x32xf32>
    %110 = vector.extract_strided_slice %107 {offsets = [0, 64], sizes = [1, 32], strides = [1, 1]} : vector<1x128xf32> to vector<1x32xf32>
    %cst_23 = arith.constant 2.000000e+00 : f32
    %111 = vector.broadcast %cst_23 : f32 to vector<1x32xf32>
    %112 = arith.mulf %111, %110 : vector<1x32xf32>
    %cst_24 = arith.constant 1.000000e+00 : f32
    %113 = vector.broadcast %cst_24 : f32 to vector<1x32xf32>
    %114 = arith.subf %112, %113 : vector<1x32xf32>
    %115 = vector.extract_strided_slice %107 {offsets = [0, 96], sizes = [1, 32], strides = [1, 1]} : vector<1x128xf32> to vector<1x32xf32>
    %116 = arith.mulf %109, %96 : vector<1x32xf32>
    %117 = arith.mulf %108, %114 : vector<1x32xf32>
    %118 = arith.addf %116, %117 : vector<1x32xf32>
    %119 = math.tanh %118 : vector<1x32xf32>
    %120 = arith.mulf %115, %119 : vector<1x32xf32>
    %121 = tpu.concatenate %54, %76, %98, %120 in 0 : vector<1x32xf32>, vector<1x32xf32>, vector<1x32xf32>, vector<1x32xf32> -> vector<4x32xf32>
    %c56 = arith.constant 56 : index
    %c0_25 = arith.constant 0 : index
    %122 = vector.load %arg2[%c56, %c0_25] : memref<168x128xf32, #tpu.memory_space<vmem>>, vector<32x128xf32>
    %123 = arith.truncf %122 : vector<32x128xf32> to vector<32x128xbf16>
    %c88 = arith.constant 88 : index
    %c0_26 = arith.constant 0 : index
    %124 = vector.load %arg2[%c88, %c0_26] : memref<168x128xf32, #tpu.memory_space<vmem>>, vector<32x128xf32>
    %125 = arith.truncf %124 : vector<32x128xf32> to vector<32x128xbf16>
    %c120 = arith.constant 120 : index
    %c0_27 = arith.constant 0 : index
    %126 = vector.load %arg2[%c120, %c0_27] : memref<168x128xf32, #tpu.memory_space<vmem>>, vector<1x128xf32>
    %127 = arith.truncf %121 : vector<4x32xf32> to vector<4x32xbf16>
    %cst_28 = arith.constant dense<0.000000e+00> : vector<4x128xf32>
    %128 = tpu.matmul %127, %123, %cst_28 {dimension_numbers = #tpu.dot_dimension_numbers<[1], [0], [0], [1], [0, 0, 1, 1], [], []>} : vector<4x32xbf16>, vector<32x128xbf16>, vector<4x128xf32> -> vector<4x128xf32>
    %129 = vector.broadcast %126 : vector<1x128xf32> to vector<4x128xf32>
    %130 = arith.addf %128, %129 : vector<4x128xf32>
    %cst_29 = arith.constant 0.000000e+00 : f32
    %131 = vector.broadcast %cst_29 : f32 to vector<1x32xf32>
    %cst_30 = arith.constant 0.000000e+00 : f32
    %132 = vector.broadcast %cst_30 : f32 to vector<1x32xf32>
    %133 = vector.extract_strided_slice %130 {offsets = [0, 0], sizes = [1, 128], strides = [1, 1]} : vector<4x128xf32> to vector<1x128xf32>
    %134 = arith.truncf %131 : vector<1x32xf32> to vector<1x32xbf16>
    %cst_31 = arith.constant dense<0.000000e+00> : vector<1x128xf32>
    %135 = tpu.matmul %134, %125, %cst_31 {dimension_numbers = #tpu.dot_dimension_numbers<[1], [0], [0], [1], [0, 0, 1, 1], [], []>} : vector<1x32xbf16>, vector<32x128xbf16>, vector<1x128xf32> -> vector<1x128xf32>
    %136 = arith.addf %133, %135 : vector<1x128xf32>
    %137 = arith.negf %136 : vector<1x128xf32>
    %138 = math.exp %137 : vector<1x128xf32>
    %cst_32 = arith.constant 1.000000e+00 : f32
    %139 = vector.broadcast %cst_32 : f32 to vector<1x128xf32>
    %140 = arith.addf %139, %138 : vector<1x128xf32>
    %141 = arith.divf %139, %140 : vector<1x128xf32>
    %142 = vector.extract_strided_slice %141 {offsets = [0, 0], sizes = [1, 32], strides = [1, 1]} : vector<1x128xf32> to vector<1x32xf32>
    %143 = vector.extract_strided_slice %141 {offsets = [0, 32], sizes = [1, 32], strides = [1, 1]} : vector<1x128xf32> to vector<1x32xf32>
    %144 = vector.extract_strided_slice %141 {offsets = [0, 64], sizes = [1, 32], strides = [1, 1]} : vector<1x128xf32> to vector<1x32xf32>
    %cst_33 = arith.constant 2.000000e+00 : f32
    %145 = vector.broadcast %cst_33 : f32 to vector<1x32xf32>
    %146 = arith.mulf %145, %144 : vector<1x32xf32>
    %cst_34 = arith.constant 1.000000e+00 : f32
    %147 = vector.broadcast %cst_34 : f32 to vector<1x32xf32>
    %148 = arith.subf %146, %147 : vector<1x32xf32>
    %149 = vector.extract_strided_slice %141 {offsets = [0, 96], sizes = [1, 32], strides = [1, 1]} : vector<1x128xf32> to vector<1x32xf32>
    %150 = arith.mulf %143, %132 : vector<1x32xf32>
    %151 = arith.mulf %142, %148 : vector<1x32xf32>
    %152 = arith.addf %150, %151 : vector<1x32xf32>
    %153 = math.tanh %152 : vector<1x32xf32>
    %154 = arith.mulf %149, %153 : vector<1x32xf32>
    %155 = vector.extract_strided_slice %130 {offsets = [1, 0], sizes = [1, 128], strides = [1, 1]} : vector<4x128xf32> to vector<1x128xf32>
    %156 = arith.truncf %154 : vector<1x32xf32> to vector<1x32xbf16>
    %cst_35 = arith.constant dense<0.000000e+00> : vector<1x128xf32>
    %157 = tpu.matmul %156, %125, %cst_35 {dimension_numbers = #tpu.dot_dimension_numbers<[1], [0], [0], [1], [0, 0, 1, 1], [], []>} : vector<1x32xbf16>, vector<32x128xbf16>, vector<1x128xf32> -> vector<1x128xf32>
    %158 = arith.addf %155, %157 : vector<1x128xf32>
    %159 = arith.negf %158 : vector<1x128xf32>
    %160 = math.exp %159 : vector<1x128xf32>
    %cst_36 = arith.constant 1.000000e+00 : f32
    %161 = vector.broadcast %cst_36 : f32 to vector<1x128xf32>
    %162 = arith.addf %161, %160 : vector<1x128xf32>
    %163 = arith.divf %161, %162 : vector<1x128xf32>
    %164 = vector.extract_strided_slice %163 {offsets = [0, 0], sizes = [1, 32], strides = [1, 1]} : vector<1x128xf32> to vector<1x32xf32>
    %165 = vector.extract_strided_slice %163 {offsets = [0, 32], sizes = [1, 32], strides = [1, 1]} : vector<1x128xf32> to vector<1x32xf32>
    %166 = vector.extract_strided_slice %163 {offsets = [0, 64], sizes = [1, 32], strides = [1, 1]} : vector<1x128xf32> to vector<1x32xf32>
    %cst_37 = arith.constant 2.000000e+00 : f32
    %167 = vector.broadcast %cst_37 : f32 to vector<1x32xf32>
    %168 = arith.mulf %167, %166 : vector<1x32xf32>
    %cst_38 = arith.constant 1.000000e+00 : f32
    %169 = vector.broadcast %cst_38 : f32 to vector<1x32xf32>
    %170 = arith.subf %168, %169 : vector<1x32xf32>
    %171 = vector.extract_strided_slice %163 {offsets = [0, 96], sizes = [1, 32], strides = [1, 1]} : vector<1x128xf32> to vector<1x32xf32>
    %172 = arith.mulf %165, %152 : vector<1x32xf32>
    %173 = arith.mulf %164, %170 : vector<1x32xf32>
    %174 = arith.addf %172, %173 : vector<1x32xf32>
    %175 = math.tanh %174 : vector<1x32xf32>
    %176 = arith.mulf %171, %175 : vector<1x32xf32>
    %177 = vector.extract_strided_slice %130 {offsets = [2, 0], sizes = [1, 128], strides = [1, 1]} : vector<4x128xf32> to vector<1x128xf32>
    %178 = arith.truncf %176 : vector<1x32xf32> to vector<1x32xbf16>
    %cst_39 = arith.constant dense<0.000000e+00> : vector<1x128xf32>
    %179 = tpu.matmul %178, %125, %cst_39 {dimension_numbers = #tpu.dot_dimension_numbers<[1], [0], [0], [1], [0, 0, 1, 1], [], []>} : vector<1x32xbf16>, vector<32x128xbf16>, vector<1x128xf32> -> vector<1x128xf32>
    %180 = arith.addf %177, %179 : vector<1x128xf32>
    %181 = arith.negf %180 : vector<1x128xf32>
    %182 = math.exp %181 : vector<1x128xf32>
    %cst_40 = arith.constant 1.000000e+00 : f32
    %183 = vector.broadcast %cst_40 : f32 to vector<1x128xf32>
    %184 = arith.addf %183, %182 : vector<1x128xf32>
    %185 = arith.divf %183, %184 : vector<1x128xf32>
    %186 = vector.extract_strided_slice %185 {offsets = [0, 0], sizes = [1, 32], strides = [1, 1]} : vector<1x128xf32> to vector<1x32xf32>
    %187 = vector.extract_strided_slice %185 {offsets = [0, 32], sizes = [1, 32], strides = [1, 1]} : vector<1x128xf32> to vector<1x32xf32>
    %188 = vector.extract_strided_slice %185 {offsets = [0, 64], sizes = [1, 32], strides = [1, 1]} : vector<1x128xf32> to vector<1x32xf32>
    %cst_41 = arith.constant 2.000000e+00 : f32
    %189 = vector.broadcast %cst_41 : f32 to vector<1x32xf32>
    %190 = arith.mulf %189, %188 : vector<1x32xf32>
    %cst_42 = arith.constant 1.000000e+00 : f32
    %191 = vector.broadcast %cst_42 : f32 to vector<1x32xf32>
    %192 = arith.subf %190, %191 : vector<1x32xf32>
    %193 = vector.extract_strided_slice %185 {offsets = [0, 96], sizes = [1, 32], strides = [1, 1]} : vector<1x128xf32> to vector<1x32xf32>
    %194 = arith.mulf %187, %174 : vector<1x32xf32>
    %195 = arith.mulf %186, %192 : vector<1x32xf32>
    %196 = arith.addf %194, %195 : vector<1x32xf32>
    %197 = math.tanh %196 : vector<1x32xf32>
    %198 = arith.mulf %193, %197 : vector<1x32xf32>
    %199 = vector.extract_strided_slice %130 {offsets = [3, 0], sizes = [1, 128], strides = [1, 1]} : vector<4x128xf32> to vector<1x128xf32>
    %200 = arith.truncf %198 : vector<1x32xf32> to vector<1x32xbf16>
    %cst_43 = arith.constant dense<0.000000e+00> : vector<1x128xf32>
    %201 = tpu.matmul %200, %125, %cst_43 {dimension_numbers = #tpu.dot_dimension_numbers<[1], [0], [0], [1], [0, 0, 1, 1], [], []>} : vector<1x32xbf16>, vector<32x128xbf16>, vector<1x128xf32> -> vector<1x128xf32>
    %202 = arith.addf %199, %201 : vector<1x128xf32>
    %203 = arith.negf %202 : vector<1x128xf32>
    %204 = math.exp %203 : vector<1x128xf32>
    %cst_44 = arith.constant 1.000000e+00 : f32
    %205 = vector.broadcast %cst_44 : f32 to vector<1x128xf32>
    %206 = arith.addf %205, %204 : vector<1x128xf32>
    %207 = arith.divf %205, %206 : vector<1x128xf32>
    %208 = vector.extract_strided_slice %207 {offsets = [0, 0], sizes = [1, 32], strides = [1, 1]} : vector<1x128xf32> to vector<1x32xf32>
    %209 = vector.extract_strided_slice %207 {offsets = [0, 32], sizes = [1, 32], strides = [1, 1]} : vector<1x128xf32> to vector<1x32xf32>
    %210 = vector.extract_strided_slice %207 {offsets = [0, 64], sizes = [1, 32], strides = [1, 1]} : vector<1x128xf32> to vector<1x32xf32>
    %cst_45 = arith.constant 2.000000e+00 : f32
    %211 = vector.broadcast %cst_45 : f32 to vector<1x32xf32>
    %212 = arith.mulf %211, %210 : vector<1x32xf32>
    %cst_46 = arith.constant 1.000000e+00 : f32
    %213 = vector.broadcast %cst_46 : f32 to vector<1x32xf32>
    %214 = arith.subf %212, %213 : vector<1x32xf32>
    %215 = vector.extract_strided_slice %207 {offsets = [0, 96], sizes = [1, 32], strides = [1, 1]} : vector<1x128xf32> to vector<1x32xf32>
    %216 = arith.mulf %209, %196 : vector<1x32xf32>
    %217 = arith.mulf %208, %214 : vector<1x32xf32>
    %218 = arith.addf %216, %217 : vector<1x32xf32>
    %219 = math.tanh %218 : vector<1x32xf32>
    %220 = arith.mulf %215, %219 : vector<1x32xf32>
    %221 = tpu.concatenate %154, %176, %198, %220 in 0 : vector<1x32xf32>, vector<1x32xf32>, vector<1x32xf32>, vector<1x32xf32> -> vector<4x32xf32>
    %c128 = arith.constant 128 : index
    %c0_47 = arith.constant 0 : index
    %222 = vector.load %arg2[%c128, %c0_47] : memref<168x128xf32, #tpu.memory_space<vmem>>, vector<32x128xf32>
    %223 = arith.truncf %222 : vector<32x128xf32> to vector<32x128xbf16>
    %c160 = arith.constant 160 : index
    %c0_48 = arith.constant 0 : index
    %224 = vector.load %arg2[%c160, %c0_48] : memref<168x128xf32, #tpu.memory_space<vmem>>, vector<1x128xf32>
    %225 = arith.truncf %221 : vector<4x32xf32> to vector<4x32xbf16>
    %cst_49 = arith.constant dense<0.000000e+00> : vector<4x128xf32>
    %226 = tpu.matmul %225, %223, %cst_49 {dimension_numbers = #tpu.dot_dimension_numbers<[1], [0], [0], [1], [0, 0, 1, 1], [], []>} : vector<4x32xbf16>, vector<32x128xbf16>, vector<4x128xf32> -> vector<4x128xf32>
    %227 = vector.broadcast %224 : vector<1x128xf32> to vector<4x128xf32>
    %228 = arith.addf %226, %227 : vector<4x128xf32>
    %229 = vector.extract_strided_slice %228 {offsets = [0, 0], sizes = [4, 8], strides = [1, 1]} : vector<4x128xf32> to vector<4x8xf32>
    %cst_50 = arith.constant 0.000000e+00 : f32
    %230 = vector.broadcast %cst_50 : f32 to vector<4x8xf32>
    %231 = arith.cmpf oge, %229, %230 : vector<4x8xf32>
    %cst_51 = arith.constant 1.000000e-01 : f32
    %232 = vector.broadcast %cst_51 : f32 to vector<4x8xf32>
    %233 = arith.mulf %232, %229 : vector<4x8xf32>
    %234 = arith.select %231, %229, %233 : vector<4x8xi1>, vector<4x8xf32>
    %c0_52 = arith.constant 0 : index
    %c0_53 = arith.constant 0 : index
    %235 = vector.load %arg3[%c0_52, %c0_53] : memref<4x8xf32, #tpu.memory_space<vmem>>, vector<4x8xf32>
    tpu.vector_store %arg3[%c0_52, %c0_53], %234 {strides = array<i32>} : memref<4x8xf32, #tpu.memory_space<vmem>>, vector<4x8xf32>,
    %236 = tpu.iota {dimensions = array<i32: 1>} : vector<4x8xi32>
    %cst_54 = arith.constant dense<0xFF800000> : vector<4xf32>
    %237 = vector.multi_reduction <maximumf>, %234, %cst_54 [1] : vector<4x8xf32> to vector<4xf32>
    %238 = vector.shape_cast %237 : vector<4xf32> to vector<4x1xf32>
    %239 = vector.broadcast %238 : vector<4x1xf32> to vector<4x8xf32>
    %240 = arith.cmpf oeq, %234, %239 : vector<4x8xf32>
    %c8_i32 = arith.constant 8 : i32
    %241 = vector.broadcast %c8_i32 : i32 to vector<4x8xi32>
    %242 = arith.select %240, %236, %241 : vector<4x8xi1>, vector<4x8xi32>
    %cst_55 = arith.constant dense<2147483647> : vector<4xi32>
    %243 = vector.multi_reduction <minsi>, %242, %cst_55 [1] : vector<4x8xi32> to vector<4xi32>
    %244 = vector.shape_cast %243 : vector<4xi32> to vector<4x1xi32>
    %c0_56 = arith.constant 0 : index
    %c0_57 = arith.constant 0 : index
    %245 = vector.load %arg4[%c0_56, %c0_57] : memref<4x1xi32, #tpu.memory_space<vmem>>, vector<4x1xi32>
    tpu.vector_store %arg4[%c0_56, %c0_57], %244 {strides = array<i32>} : memref<4x1xi32, #tpu.memory_space<vmem>>, vector<4x1xi32>,
    return
  }
}

</mosaic_0001>

<bundles_post_ra>
// kernel: tpu_custom_call.1
= control target key start
LH: loop header
LB: loop body
LE: loop exit
PB: predicated region body
PF: predicated region fallthrough
CT: control target
= control target key end

     0   :  { %10 = vsyncpa [#allocation5], 0  ;;  %s1504_s0 = inlined_call_operand.vmem [shape: s32[4], index: 0, kind: input, shape index: {}]   ;;  %s1505_s1 = inlined_call_operand.vmem [shape: f32[50,16], index: 1, kind: input, shape index: {}]   ;;  %s1506_s2 = inlined_call_operand.hbm [shape: f32[168,128], index: 2, kind: input, shape index: {}]   ;;  %s1507_s3 = inlined_call_operand.hbm [shape: f32[4,8], index: 3, kind: output, shape index: {0}]   ;;  %s1508_s4 = inlined_call_operand.vmem [shape: s32[4,1], index: 4, kind: output, shape index: {1}]  }
   0x1   :  { %11 = vsyncpa [#allocation3], 0 }
   0x2   :  { %12 = vsyncpa [#allocation4], 0  ;;  %s19_s17 = sshll.u32 %s1504_s0, 4  ;;  %s20_s17 = int_to_ptr.vmem [resolvable:$true] %s19_s17 }
   0x3   :  { %s1204_s18 = scalar_lea.vmem %s20_s17, 16  ;;  %p1209_p1 = scmp.lt.s32.totalorder %s20_s17, %s20_s17 }
   0x4   :  { %p1205_p0 = scmp.ne.s32.totalorder %s20_s17, %s1204_s18  ;;  %p1210_p2 = scmp.lt.s32.totalorder %s1204_s18, %s1204_s18 }
   0x6   :  { %p1211_p3 = por %p1210_p2, %p1209_p1 }
   0x8   :  { %p1212_p4 = pnand %p1211_p3, %p1205_p0 }
   0xa   :  { %1215 = shalt.err (!%p1212_p4)
}
   0xb   :  { %s1266_s19 = smov [#allocation2]   ;;  %s1267_s20 = smov [#allocation6]  }
   0xc   :  { %22 = dma.vmem_to_smem %s20_s17, 16, %s1266_s19, [#allocation5]  }
   0xd   :  { %s30_s21 = sshll.u32 %s1267_s20, 4  ;;  %s1216_s24 = scalar_lea.hbm %s1506_s2, 2688  ;;  %s31_s21 = int_to_ptr.vmem [resolvable:$true] %s30_s21 }
   0xe   :  { %p1217_p5 = scmp.ne.s32.totalorder %s1506_s2, %s1216_s24  ;;  %p1220_p6 = scmp.lt.u32.totalorder %s1216_s24, %s1506_s2 }
  0x10   :  { %p1222_p7 = pnand %p1220_p6, %p1217_p5 }
  0x12   :  { %1225 = shalt.err (!%p1222_p7)
}
  0x13   :  { %s1226_s28 = scalar_lea.vmem %s31_s21, 2688  ;;  %p1231_p9 = scmp.lt.s32.totalorder %s31_s21, %s31_s21 }
  0x14   :  { %p1227_p8 = scmp.ne.s32.totalorder %s31_s21, %s1226_s28  ;;  %p1232_p10 = scmp.lt.s32.totalorder %s1226_s28, %s1226_s28 }
  0x16   :  { %p1233_p11 = por %p1232_p10, %p1231_p9 }
  0x18   :  { %p1234_p12 = pnand %p1233_p11, %p1227_p8 }
  0x1a   :  { %1237 = shalt.err (!%p1234_p12)
}
  0x1b   :  { %s1268_s29 = smov 128   ;;  %s1269_s30 = smov 8  }
  0x1c   :  { %36 = dma.hbm_to_vmem [thread:$0]  %s1506_s2, 2688, %s31_s21, [#allocation3], %s1268_s29, %s1268_s29, %s1269_s30  }
  0x1d   :  { %1260 = dma.done.wait [#allocation5], 16  }
  0x1e   :  { %1261 = vsyncadd [#allocation5], 4294967280 }
  0x1f   :  { %1262 = dma.done.wait [#allocation3], 2688  }
  0x20   :  { %1263 = vsyncadd [#allocation3], 4294964608 }
  0x21   :  { %43 = sfence }
  0x22   :  { %v71_v0 = vld [vmem:[%s1505_s1] sm:$0xff]  ;;  %v72_v1 = vld [vmem:[%s1505_s1 + $0x8] sm:$0xff]  ;;  %v73_v2 = vld [vmem:[%s1505_s1 + $0x10] sm:$0xff]  ;;  %v45_v3 = vlaneseq  ;;  %s47_s13 = sld [smem:[#allocation2]]  ;;  %v1270_v4 = vmov 0.0   ;;  %s979_s15 = sld [smem:[#allocation2 + $0x1]] }
  0x23   :  { %1048 = vmatprep.subr.bf16.mxu0 %v1270_v4  ;;  %v78_v5 = vpack.c.bf16 %v72_v1, %v71_v0  ;;  %v74_v6 = vld [vmem:[%s1505_s1 + $0x18] sm:$0xff]  ;;  %1060 = vmatprep.subr.bf16.mxu1 %v1270_v4  ;;  %v75_v7 = vld [vmem:[%s1505_s1 + $0x20] sm:$0xff]  ;;  %s980_s18 = sld [smem:[#allocation2 + $0x2]]  ;;  %v76_v9 = vld [vmem:[%s1505_s1 + $0x28] sm:$0xff]  ;;  %s981_s21 = sld [smem:[#allocation2 + $0x3]]  ;;  %vm1271_vm0 = vmmov 0  }
  0x24   :  { %v79_v8 = vpack.c.bf16 %v74_v6, %v73_v2  ;;  %v1336_v10 = vand.u32 127, %v45_v3  ;;  %v129_v11 = vld [vmem:[#allocation6] sm:$0xff]  ;;  %v77_v12 = vld [vmem:[%s1505_s1 + $0x30] sm:$0x3]  ;;  %1056 = vmatprep.mubr.msk.bf16.mxu0 %vm1271_vm0, %v1270_v4  ;;  %v130_v13 = vld [vmem:[#allocation6 + $0x8] sm:$0xff]  ;;  %1062 = vmatprep.mubr.msk.bf16.mxu1 %vm1271_vm0, %v1270_v4  ;;  %v80_v15 = vpack.c.bf16 %v76_v9, %v75_v7  ;;  %vm63_vm2 = vcmask 1040384  }
  0x25   :  { %1049 = vmatpush3.bf16.msra.mxu0 %v78_v5  ;;  %v131_v14 = vpack.c.bf16 %v130_v13, %v129_v11  ;;  %v81_v18 = vpack.c.bf16 %v77_v12, %v77_v12  ;;  %v1272_v19 = vmov 0   ;;  %vm65_vm4 = vcmask 1041408   ;;  %v132_v32 = vld [vmem:[#allocation6 + $0x10] sm:$0xff]  ;;  %v133_v33 = vld [vmem:[#allocation6 + $0x18] sm:$0xff]  ;;  %v134_v35 = vld [vmem:[#allocation6 + $0x20] sm:$0xff]  ;;  %s1273_s1 = smov 64  }
  0x26   :  { %1050 = vmatprep.subr.bf16.mxu0 %v1270_v4  ;;  %vm67_vm6 = vcmask 1042432   ;;  %vm82_vm8 = vcmask 408576   ;;  %v1364_v34 = vpack.c.bf16 %v133_v33, %v132_v32  ;;  %v135_v36 = vld [vmem:[#allocation6 + $0x28] sm:$0xff]  ;;  %vm144_vm9 = vcmask 130048   ;;  %v983_v47 = vld [vmem:[#allocation6 + $0x30] ss:$0 sm:$0xff] }
  0x27   :  { %1061 = vmatpush3.bf16.msra.mxu1 %v131_v14  ;;  %v87_v28 = vsel %vm63_vm2, %v81_v18, 0  ;;  %v137_v37 = vpack.c.bf16 %v135_v36, %v134_v35  ;;  %s1274_s24 = smov 32   ;;  %vm188_vm10 = vcmask 261120   ;;  %vm935_vm12 = vcmask 60416   ;;  %s1275_s25 = smov [#allocation7]  }
  0x28   :  { %v48_v16 = vstv %s47_s13  ;;  %v52_v17 = vstv %s979_s15  ;;  %1066 = vmatprep.subr.bf16.mxu1 %v1270_v4  ;;  %s965_s26 = sshll.u32 %s1275_s25, 4  ;;  %s966_s26 = int_to_ptr.vmem [resolvable:$true] %s965_s26 }
  0x29   :  { %1051 = vmatpush3.bf16.msra.mxu0 %v79_v8  ;;  %vm49_vm1 = vcmp.eq.s32.totalorder %v1336_v10, %v48_v16  ;;  %vm53_vm3 = vcmp.eq.s32.totalorder %v1336_v10, %v52_v17  ;;  %v56_v21 = vstv %s980_s18  ;;  %v60_v23 = vstv %s981_s21  ;;  %s1238_s0 = scalar_lea.vmem %s966_s26, 64  ;;  %p1243_p0 = scmp.lt.s32.totalorder %s966_s26, %s966_s26 }
  0x2a   :  { %1052 = vmatprep.subr.bf16.mxu0 %v1270_v4  ;;  %v50_v20 = vsel %vm49_vm1, 1, %v1272_v19  ;;  %v54_v22 = vsel %vm53_vm3, 1, %v1272_v19  ;;  %vm57_vm5 = vcmp.eq.s32.totalorder %v1336_v10, %v56_v21  ;;  %vm61_vm7 = vcmp.eq.s32.totalorder %v1336_v10, %v60_v23  ;;  %p1239_p13 = scmp.ne.s32.totalorder %s966_s26, %s1238_s0  ;;  %p1244_p1 = scmp.lt.s32.totalorder %s1238_s0, %s1238_s0 }
  0x2b   :  { %v64_v24 = vsel %vm63_vm2, %v50_v20, %v54_v22  ;;  %v58_v25 = vsel %vm57_vm5, 1, %v1272_v19  ;;  %v62_v26 = vsel %vm61_vm7, 1, %v1272_v19 }
  0x2c   :  { %v66_v27 = vsel %vm65_vm4, %v64_v24, %v58_v25  ;;  %p1245_p2 = por %p1244_p1, %p1243_p0 }
  0x2d   :  { %1053 = vmatpush3.bf16.msra.mxu0 %v80_v15  ;;  %v68_v29 = vsel %vm67_vm6, %v66_v27, %v62_v26 }
  0x2e   :  { %1054 = vmatprep.subr.bf16.mxu0 %v1270_v4  ;;  %v69_v30 = vcvt.s32.f32 %v68_v29  ;;  %p1246_p3 = pnand %p1245_p2, %p1239_p13 }
  0x30   :  { %v70_v31 = vpack.c.bf16 %v69_v30, %v69_v30 }
  0x31   :  { %1055 = vmatpush3.bf16.msra.mxu0 %v87_v28 }
  0x32   :  { %1082 = vmatprep.subr.bf16.mxu0 %v1270_v4 }
  0x34   :  { %1057 = vmatmul.mubr.msk.bf16.vlgmr.msra.gmra.mrb[0].mxu0 %vm82_vm8, %v70_v31 }
  0x35   :  { %1086 = vmatprep.mubr.msk.bf16.mxu0 %vm1271_vm0, %v1270_v4  ;;  %1083 = vmatpush3.bf16.msra.mxu0 %v1364_v34 }
  0x36   :  { %1084 = vmatprep.subr.bf16.mxu0 %v1270_v4 }
  0x39   :  { %1085 = vmatpush3.bf16.msra.mxu0 %v137_v37 }
  0x3a   :  { %1098 = vmatprep.subr.bf16.mxu0 %v1270_v4 }
 0x107   :  { %v123_v38 = vpop.f32.mrb[0].mxu0 }
 0x108   :  { %v139_v39 = vpack.c.bf16 %v123_v38, %v123_v38  ;;  %v1058_v40 = vpop.f32.mrb[1].mxu0 }
 0x109   :  { %v126_v41 = vpop.f32.mrb[2].mxu0 }
 0x10a   :  { %v1059_v42 = vpop.f32.mrb[3].mxu0  ;;  %1063 = vmatmul.mubr.msk.bf16.vlgmr.msra.gmra.mrb[0].mxu1 %vm144_vm9, %v139_v39 }
 0x10b   :  { %1067 = vmatpush3.bf16.msra.mxu1 %v1364_v34  ;;  %1070 = vmatprep.mubr.msk.bf16.mxu1 %vm1271_vm0, %v1270_v4 }
 0x10c   :  { %1068 = vmatprep.subr.bf16.mxu1 %v1270_v4 }
 0x10f   :  { %1069 = vmatpush3.bf16.msra.mxu1 %v137_v37 }
 0x110   :  { %1074 = vmatprep.subr.bf16.mxu1 %v1270_v4 }
 0x112   :  { %1071 = vmatmul.mubr.bf16.vlgmr.msra.gmra.mrb[4].mxu1 %v1272_v19 }
 0x113   :  { %1075 = vmatpush3.bf16.msra.mxu1 %v1364_v34  ;;  %1078 = vmatprep.mubr.msk.bf16.mxu1 %vm1271_vm0, %v1270_v4 }
 0x114   :  { %1076 = vmatprep.subr.bf16.mxu1 %v1270_v4 }
 0x117   :  { %1077 = vmatpush3.bf16.msra.mxu1 %v137_v37 }
 0x118   :  { %1090 = vmatprep.subr.bf16.mxu1 %v1270_v4 }
 0x1dd   :  { %v182_v43 = vpop.f32.mrb[0].mxu1 }
 0x1de   :  { %v1064_v44 = vpop.f32.mrb[1].mxu1  ;;  %v1380_v48 = vadd.f32 %v983_v47, %v182_v43 }
 0x1df   :  { %v185_v45 = vpop.f32.mrb[2].mxu1 }
 0x1e0   :  { %v1065_v46 = vpop.f32.mrb[3].mxu1 }
 0x1e5   :  { %v226_v49 = vpop.f32.mrb[4].mxu1 }
 0x1e6   :  { %v232_v50 = vadd.f32 %v226_v49, %v1380_v48  ;;  %v1072_v51 = vpop.f32.mrb[5].mxu1 }
 0x1e7   :  { %v229_v52 = vpop.f32.mrb[6].mxu1 }
 0x1e8   :  { %v985_v53 = vmul.f32 -1.442695, %v232_v50  ;;  %v1073_v54 = vpop.f32.mrb[7].mxu1 }
 0x1ea   :  { %1156 = vpow2.f32 %v985_v53 }
 0x1f4   :  { %v1157_v55 = vpop.eup %1156 }
 0x1f5   :  { %v236_v56 = vadd.f32 1.0, %v1157_v55 }
 0x1f7   :  { %1158 = vrcp.f32 %v236_v56 }
 0x201   :  { %v1159_v57 = vpop.eup %1158 }
 0x202   :  { %v239_v58 = vmul.f32 2.0, %v1159_v57  ;;  %v241_v62 = vmul.f32 0.0, %v1159_v57 }
 0x204   :  { %v986_v59 = vadd.f32 -1.0, %v239_v58 }
 0x206   :  { %243 = vrot.lane.b32.xlu0 %v986_v59, %s1273_s1 }
 0x278   :  { %v244_v60 = vpop.permute.xlu0 %243 }
 0x279   :  { %v246_v61 = vmul.f32 %v1159_v57, %v244_v60 }
 0x27b   :  { %248 = vrot.lane.b32.xlu0 %v246_v61, %s1274_s24 }
 0x2ed   :  { %v249_v63 = vpop.permute.xlu0 %248 }
 0x2ee   :  { %v251_v0 = vadd.f32 %v249_v63, %v241_v62 }
 0x2f0   :  { %1160 = vtanh.f32 %v251_v0  ;;  %v318_v23 = vrot.slane %v251_v0, 7 }
 0x2fa   :  { %v1161_v1 = vpop.eup %1160 }
 0x2fb   :  { %254 = vrot.lane.b32.xlu1 %v1161_v1, %s1273_s1 }
 0x36d   :  { %v255_v2 = vpop.permute.xlu1 %254 }
 0x36e   :  { %v1386_v3 = vmul.f32 %v1159_v57, %v255_v2 }
 0x370   :  { %v258_v5 = vpack.c.bf16 %v1386_v3, %v1386_v3 }
 0x372   :  { %260 = vrot.lane.b32.xlu1 %v258_v5, %s1274_s24 }
 0x3e4   :  { %v261_v6 = vpop.permute.xlu1 %260 }
 0x3e5   :  { %1079 = vmatmul.mubr.msk.bf16.vlgmr.msra.gmra.mrb[8].mxu1 %vm188_vm10, %v261_v6 }
 0x3e6   :  { %1091 = vmatpush3.bf16.msra.mxu1 %v1364_v34  ;;  %1094 = vmatprep.mubr.msk.bf16.mxu1 %vm1271_vm0, %v1270_v4 }
 0x3e7   :  { %1092 = vmatprep.subr.bf16.mxu1 %v1270_v4 }
 0x3ea   :  { %1093 = vmatpush3.bf16.msra.mxu1 %v137_v37 }
 0x3eb   :  { %1106 = vmatprep.subr.bf16.mxu1 %v1270_v4 }
 0x4b8   :  { %v299_v7 = vpop.f32.mrb[8].mxu1 }
 0x4b9   :  { %v306_v8 = vrot.slane %v299_v7, 7  ;;  %v1080_v9 = vpop.f32.mrb[9].mxu1 }
 0x4ba   :  { %v302_v11 = vpop.f32.mrb[10].mxu1 }
 0x4bb   :  { %v308_v12 = vadd.f32 %v306_v8, %v1380_v48  ;;  %v1081_v13 = vpop.f32.mrb[11].mxu1 }
 0x4bd   :  { %v988_v14 = vmul.f32 -1.442695, %v308_v12 }
 0x4bf   :  { %1162 = vpow2.f32 %v988_v14 }
 0x4c9   :  { %v1163_v15 = vpop.eup %1162 }
 0x4ca   :  { %v312_v16 = vadd.f32 1.0, %v1163_v15 }
 0x4cc   :  { %1164 = vrcp.f32 %v312_v16  ;;  %v502_v16 = vld [vmem:[#allocation6 + $0x40] sm:$0xff] }
 0x4d6   :  { %v1165_v17 = vpop.eup %1164 }
 0x4d7   :  { %v315_v18 = vmul.f32 2.0, %v1165_v17  ;;  %v320_v24 = vmul.f32 %v1165_v17, %v318_v23 }
 0x4d9   :  { %v989_v20 = vadd.f32 -1.0, %v315_v18 }
 0x4db   :  { %322 = vrot.lane.b32.xlu0 %v989_v20, %s1273_s1  ;;  %v508_v20 = vld [vmem:[#allocation6 + $0x60] sm:$0xff] }
 0x54d   :  { %v323_v21 = vpop.permute.xlu0 %322 }
 0x54e   :  { %v325_v22 = vmul.f32 %v1165_v17, %v323_v21  ;;  %v503_v21 = vld [vmem:[#allocation6 + $0x48] sm:$0xff] }
 0x550   :  { %327 = vrot.lane.b32.xlu1 %v325_v22, %s1274_s24  ;;  %v504_v22 = vld [vmem:[#allocation6 + $0x50] sm:$0xff] }
 0x5c2   :  { %v328_v25 = vpop.permute.xlu1 %327 }
 0x5c3   :  { %v330_v26 = vadd.f32 %v328_v25, %v320_v24  ;;  %v509_v24 = vld [vmem:[#allocation6 + $0x68] sm:$0xff]  ;;  %v510_v25 = vld [vmem:[#allocation6 + $0x70] sm:$0xff] }
 0x5c5   :  { %1166 = vtanh.f32 %v330_v26  ;;  %v399_v47 = vrot.slane %v330_v26, 7  ;;  %v506_v26 = vpack.c.bf16 %v504_v22, %v503_v21 }
 0x5cf   :  { %v1167_v27 = vpop.eup %1166 }
 0x5d0   :  { %333 = vrot.lane.b32.xlu0 %v1167_v27, %s1273_s1  ;;  %v1423_v27 = vpack.c.bf16 %v510_v25, %v509_v24 }
 0x642   :  { %v334_v28 = vpop.permute.xlu0 %333 }
 0x643   :  { %v336_v29 = vmul.f32 %v1165_v17, %v334_v28  ;;  %v507_v17 = vld [vmem:[#allocation6 + $0x58] sm:$0xff] }
 0x644   :  { %v1419_v23 = vpack.c.bf16 %v508_v20, %v507_v17 }
 0x645   :  { %v337_v30 = vpack.c.bf16 %v336_v29, %v336_v29  ;;  %v498_v55 = vsel %vm63_vm2, %v1386_v3, %v336_v29 }
 0x647   :  { %v339_v31 = vshrl.u32 %v337_v30, 16 }
 0x649   :  { %341 = vrot.lane.b32.xlu1 %v339_v31, %s1274_s24 }
 0x6bb   :  { %v342_v32 = vpop.permute.xlu1 %341 }
 0x6bc   :  { %1087 = vmatmul.mubr.msk.bf16.vlgmr.msra.gmra.mrb[4].mxu0 %vm188_vm10, %v342_v32 }
 0x6bd   :  { %1102 = vmatprep.mubr.msk.bf16.mxu0 %vm1271_vm0, %v1270_v4 }
 0x78f   :  { %v380_v33 = vpop.f32.mrb[4].mxu0 }
 0x790   :  { %v387_v34 = vrot.slane %v380_v33, 6  ;;  %v1088_v35 = vpop.f32.mrb[5].mxu0 }
 0x791   :  { %v383_v36 = vpop.f32.mrb[6].mxu0 }
 0x792   :  { %v389_v37 = vadd.f32 %v387_v34, %v1380_v48  ;;  %v1089_v38 = vpop.f32.mrb[7].mxu0 }
 0x794   :  { %v991_v39 = vmul.f32 -1.442695, %v389_v37  ;;  %v996_v37 = vld [vmem:[#allocation6 + $0x78] ss:$0 sm:$0xff] }
 0x796   :  { %1168 = vpow2.f32 %v991_v39 }
 0x7a0   :  { %v1169_v40 = vpop.eup %1168 }
 0x7a1   :  { %v393_v41 = vadd.f32 1.0, %v1169_v40 }
 0x7a3   :  { %1170 = vrcp.f32 %v393_v41 }
 0x7ad   :  { %v1171_v42 = vpop.eup %1170 }
 0x7ae   :  { %v396_v43 = vmul.f32 2.0, %v1171_v42  ;;  %v401_v49 = vmul.f32 %v1171_v42, %v399_v47 }
 0x7b0   :  { %v992_v44 = vadd.f32 -1.0, %v396_v43 }
 0x7b2   :  { %403 = vrot.lane.b32.xlu0 %v992_v44, %s1273_s1 }
 0x824   :  { %v404_v45 = vpop.permute.xlu0 %403 }
 0x825   :  { %v406_v46 = vmul.f32 %v1171_v42, %v404_v45 }
 0x827   :  { %408 = vrot.lane.b32.xlu1 %v406_v46, %s1274_s24 }
 0x899   :  { %v409_v50 = vpop.permute.xlu1 %408 }
 0x89a   :  { %v411_v51 = vadd.f32 %v409_v50, %v401_v49 }
 0x89c   :  { %1172 = vtanh.f32 %v411_v51  ;;  %v479_v12 = vrot.slane %v411_v51, 7 }
 0x8a6   :  { %v1173_v52 = vpop.eup %1172 }
 0x8a7   :  { %414 = vrot.lane.b32.xlu0 %v1173_v52, %s1273_s1 }
 0x919   :  { %v415_v53 = vpop.permute.xlu0 %414 }
 0x91a   :  { %v417_v54 = vmul.f32 %v1171_v42, %v415_v53 }
 0x91c   :  { %v418_v56 = vpack.c.bf16 %v417_v54, %v417_v54  ;;  %v499_v57 = vsel %vm65_vm4, %v498_v55, %v417_v54 }
 0x91e   :  { %v420_v58 = vrot.slane %v418_v56, 1 }
 0x920   :  { %421 = vrot.lane.b32.xlu1 %v420_v58, %s1274_s24 }
 0x992   :  { %v422_v59 = vpop.permute.xlu1 %421 }
 0x993   :  { %1095 = vmatmul.mubr.msk.bf16.vlgmr.msra.gmra.mrb[12].mxu1 %vm188_vm10, %v422_v59 }
 0x994   :  { %1110 = vmatprep.mubr.msk.bf16.mxu1 %vm1271_vm0, %v1270_v4  ;;  %1107 = vmatpush3.bf16.msra.mxu1 %v1419_v23 }
 0x995   :  { %1108 = vmatprep.subr.bf16.mxu1 %v1270_v4 }
 0x998   :  { %1109 = vmatpush3.bf16.msra.mxu1 %v1423_v27 }
 0x999   :  { %1122 = vmatprep.subr.bf16.mxu1 %v1270_v4 }
 0x99b   :  { %1111 = vmatmul.mubr.bf16.vlgmr.msra.gmra.mrb[16].mxu1 %v1272_v19 }
 0x99c   :  { %1123 = vmatpush3.bf16.msra.mxu1 %v1419_v23  ;;  %1126 = vmatprep.mubr.msk.bf16.mxu1 %vm1271_vm0, %v1270_v4 }
 0x99d   :  { %1124 = vmatprep.subr.bf16.mxu1 %v1270_v4 }
 0x9a0   :  { %1125 = vmatpush3.bf16.msra.mxu1 %v1423_v27 }
 0x9a1   :  { %1138 = vmatprep.subr.bf16.mxu1 %v1270_v4 }
 0xa66   :  { %v460_v60 = vpop.f32.mrb[12].mxu1 }
 0xa67   :  { %v467_v61 = vrot.slane %v460_v60, 5  ;;  %v1096_v62 = vpop.f32.mrb[13].mxu1 }
 0xa68   :  { %v463_v63 = vpop.f32.mrb[14].mxu1 }
 0xa69   :  { %v469_v0 = vadd.f32 %v467_v61, %v1380_v48  ;;  %v1097_v1 = vpop.f32.mrb[15].mxu1  ;;  %v501_v48 = vld [vmem:[#allocation6 + $0x38] sm:$0xff] }
 0xa6a   :  { %v505_v18 = vpack.c.bf16 %v502_v16, %v501_v48 }
 0xa6b   :  { %v994_v2 = vmul.f32 -1.442695, %v469_v0 }
 0xa6c   :  { %1099 = vmatpush3.bf16.msra.mxu0 %v505_v18 }
 0xa6d   :  { %1174 = vpow2.f32 %v994_v2  ;;  %1100 = vmatprep.subr.bf16.mxu0 %v1270_v4 }
 0xa6e   :  { %v599_v33 = vpop.f32.mrb[16].mxu1 }
 0xa6f   :  { %v1112_v19 = vpop.f32.mrb[17].mxu1 }
 0xa70   :  { %1101 = vmatpush3.bf16.msra.mxu0 %v506_v26  ;;  %v602_v34 = vpop.f32.mrb[18].mxu1 }
 0xa71   :  { %1114 = vmatprep.subr.bf16.mxu0 %v1270_v4  ;;  %v1113_v35 = vpop.f32.mrb[19].mxu1 }
 0xa77   :  { %v1175_v3 = vpop.eup %1174 }
 0xa78   :  { %v473_v5 = vadd.f32 1.0, %v1175_v3 }
 0xa7a   :  { %1176 = vrcp.f32 %v473_v5 }
 0xa84   :  { %v1177_v6 = vpop.eup %1176 }
 0xa85   :  { %v476_v7 = vmul.f32 2.0, %v1177_v6  ;;  %v481_v13 = vmul.f32 %v1177_v6, %v479_v12 }
 0xa87   :  { %v995_v8 = vadd.f32 -1.0, %v476_v7 }
 0xa89   :  { %483 = vrot.lane.b32.xlu0 %v995_v8, %s1273_s1 }
 0xafb   :  { %v484_v9 = vpop.permute.xlu0 %483 }
 0xafc   :  { %v486_v11 = vmul.f32 %v1177_v6, %v484_v9 }
 0xafe   :  { %488 = vrot.lane.b32.xlu1 %v486_v11, %s1274_s24 }
 0xb70   :  { %v489_v14 = vpop.permute.xlu1 %488 }
 0xb71   :  { %v491_v15 = vadd.f32 %v489_v14, %v481_v13 }
 0xb73   :  { %1178 = vtanh.f32 %v491_v15 }
 0xb7d   :  { %v1179_v28 = vpop.eup %1178 }
 0xb7e   :  { %494 = vrot.lane.b32.xlu0 %v1179_v28, %s1273_s1 }
 0xbf0   :  { %v495_v29 = vpop.permute.xlu0 %494 }
 0xbf1   :  { %v497_v30 = vmul.f32 %v1177_v6, %v495_v29 }
 0xbf3   :  { %v500_v31 = vsel %vm67_vm6, %v499_v57, %v497_v30 }
 0xbf4   :  { %v514_v32 = vpack.c.bf16 %v500_v31, %v500_v31 }
 0xbf6   :  { %520 = vrot.lane.b32.xlu1 %v514_v32, %s1274_s24 }
 0xc68   :  { %v521_v36 = vpop.permute.xlu1 %520 }
 0xc69   :  { %1103 = vmatmul.mubr.msk.bf16.vlgmr.msra.gmra.mrb[8].mxu0 %vm188_vm10, %v521_v36 }
 0xc6a   :  { %1115 = vmatpush3.bf16.msra.mxu0 %v1419_v23  ;;  %1118 = vmatprep.mubr.msk.bf16.mxu0 %vm1271_vm0, %v1270_v4 }
 0xc6b   :  { %1116 = vmatprep.subr.bf16.mxu0 %v1270_v4 }
 0xc6e   :  { %1117 = vmatpush3.bf16.msra.mxu0 %v1423_v27 }
 0xc6f   :  { %1130 = vmatprep.subr.bf16.mxu0 %v1270_v4 }
 0xd3c   :  { %v559_v38 = vpop.f32.mrb[8].mxu0 }
 0xd3d   :  { %v1446_v39 = vadd.f32 %v996_v37, %v559_v38  ;;  %v1104_v40 = vpop.f32.mrb[9].mxu0 }
 0xd3e   :  { %v562_v41 = vpop.f32.mrb[10].mxu0 }
 0xd3f   :  { %v605_v42 = vadd.f32 %v599_v33, %v1446_v39  ;;  %v1105_v43 = vpop.f32.mrb[11].mxu0 }
 0xd41   :  { %v998_v44 = vmul.f32 -1.442695, %v605_v42 }
 0xd43   :  { %1180 = vpow2.f32 %v998_v44 }
 0xd4d   :  { %v1181_v45 = vpop.eup %1180 }
 0xd4e   :  { %v609_v46 = vadd.f32 1.0, %v1181_v45 }
 0xd50   :  { %1182 = vrcp.f32 %v609_v46 }
 0xd5a   :  { %v1183_v47 = vpop.eup %1182 }
 0xd5b   :  { %v612_v49 = vmul.f32 2.0, %v1183_v47  ;;  %v614_v53 = vmul.f32 0.0, %v1183_v47 }
 0xd5d   :  { %v999_v50 = vadd.f32 -1.0, %v612_v49 }
 0xd5f   :  { %616 = vrot.lane.b32.xlu0 %v999_v50, %s1273_s1 }
 0xdd1   :  { %v617_v51 = vpop.permute.xlu0 %616 }
 0xdd2   :  { %v619_v52 = vmul.f32 %v1183_v47, %v617_v51 }
 0xdd4   :  { %621 = vrot.lane.b32.xlu1 %v619_v52, %s1274_s24 }
 0xe46   :  { %v622_v54 = vpop.permute.xlu1 %621 }
 0xe47   :  { %v624_v55 = vadd.f32 %v622_v54, %v614_v53 }
 0xe49   :  { %1184 = vtanh.f32 %v624_v55  ;;  %v691_v13 = vrot.slane %v624_v55, 7 }
 0xe53   :  { %v1185_v56 = vpop.eup %1184 }
 0xe54   :  { %627 = vrot.lane.b32.xlu0 %v1185_v56, %s1273_s1 }
 0xec6   :  { %v628_v57 = vpop.permute.xlu0 %627 }
 0xec7   :  { %v1452_v58 = vmul.f32 %v1183_v47, %v628_v57 }
 0xec9   :  { %v631_v59 = vpack.c.bf16 %v1452_v58, %v1452_v58 }
 0xecb   :  { %633 = vrot.lane.b32.xlu1 %v631_v59, %s1274_s24 }
 0xf3d   :  { %v634_v60 = vpop.permute.xlu1 %633 }
 0xf3e   :  { %1119 = vmatmul.mubr.msk.bf16.vlgmr.msra.gmra.mrb[12].mxu0 %vm188_vm10, %v634_v60 }
 0xf3f   :  { %1131 = vmatpush3.bf16.msra.mxu0 %v1419_v23  ;;  %1134 = vmatprep.mubr.msk.bf16.mxu0 %vm1271_vm0, %v1270_v4 }
 0xf40   :  { %1132 = vmatprep.subr.bf16.mxu0 %v1270_v4 }
 0xf43   :  { %1133 = vmatpush3.bf16.msra.mxu0 %v1423_v27 }
0x1011   :  { %v672_v61 = vpop.f32.mrb[12].mxu0 }
0x1012   :  { %v679_v62 = vrot.slane %v672_v61, 7  ;;  %v1120_v63 = vpop.f32.mrb[13].mxu0 }
0x1013   :  { %v675_v0 = vpop.f32.mrb[14].mxu0 }
0x1014   :  { %v681_v1 = vadd.f32 %v679_v62, %v1446_v39  ;;  %v1121_v2 = vpop.f32.mrb[15].mxu0 }
0x1016   :  { %v1001_v3 = vmul.f32 -1.442695, %v681_v1 }
0x1018   :  { %1186 = vpow2.f32 %v1001_v3 }
0x1022   :  { %v1187_v5 = vpop.eup %1186 }
0x1023   :  { %v685_v6 = vadd.f32 1.0, %v1187_v5  ;;  %v875_v5 = vld [vmem:[#allocation6 + $0x88] sm:$0xff] }
0x1025   :  { %1188 = vrcp.f32 %v685_v6  ;;  %v876_v6 = vld [vmem:[#allocation6 + $0x90] sm:$0xff] }
0x102f   :  { %v1189_v7 = vpop.eup %1188 }
0x1030   :  { %v688_v8 = vmul.f32 2.0, %v1189_v7  ;;  %v693_v14 = vmul.f32 %v1189_v7, %v691_v13 }
0x1032   :  { %v1002_v9 = vadd.f32 -1.0, %v688_v8  ;;  %v877_v8 = vld [vmem:[#allocation6 + $0x98] sm:$0xff] }
0x1034   :  { %695 = vrot.lane.b32.xlu0 %v1002_v9, %s1273_s1  ;;  %v879_v9 = vpack.c.bf16 %v877_v8, %v876_v6 }
0x10a6   :  { %v696_v11 = vpop.permute.xlu0 %695 }
0x10a7   :  { %v698_v12 = vmul.f32 %v1189_v7, %v696_v11 }
0x10a9   :  { %700 = vrot.lane.b32.xlu1 %v698_v12, %s1274_s24 }
0x111b   :  { %v701_v15 = vpop.permute.xlu1 %700 }
0x111c   :  { %v703_v48 = vadd.f32 %v701_v15, %v693_v14 }
0x111e   :  { %1190 = vtanh.f32 %v703_v48  ;;  %v772_v36 = vrot.slane %v703_v48, 7 }
0x1128   :  { %v1191_v16 = vpop.eup %1190 }
0x1129   :  { %706 = vrot.lane.b32.xlu0 %v1191_v16, %s1273_s1  ;;  %v1009_v16 = vld [vmem:[#allocation6 + $0xa0] ss:$0 sm:$0xff] }
0x119b   :  { %v707_v17 = vpop.permute.xlu0 %706 }
0x119c   :  { %v709_v18 = vmul.f32 %v1189_v7, %v707_v17 }
0x119e   :  { %v710_v20 = vpack.c.bf16 %v709_v18, %v709_v18  ;;  %v871_v44 = vsel %vm63_vm2, %v1452_v58, %v709_v18 }
0x11a0   :  { %v712_v21 = vshrl.u32 %v710_v20, 16 }
0x11a2   :  { %714 = vrot.lane.b32.xlu1 %v712_v21, %s1274_s24 }
0x1214   :  { %v715_v22 = vpop.permute.xlu1 %714 }
0x1215   :  { %1127 = vmatmul.mubr.msk.bf16.vlgmr.msra.gmra.mrb[20].mxu1 %vm188_vm10, %v715_v22 }
0x1216   :  { %1142 = vmatprep.mubr.msk.bf16.mxu1 %vm1271_vm0, %v1270_v4 }
0x12e8   :  { %v753_v23 = vpop.f32.mrb[20].mxu1 }
0x12e9   :  { %v760_v24 = vrot.slane %v753_v23, 6  ;;  %v1128_v25 = vpop.f32.mrb[21].mxu1 }
0x12ea   :  { %v756_v26 = vpop.f32.mrb[22].mxu1 }
0x12eb   :  { %v762_v27 = vadd.f32 %v760_v24, %v1446_v39  ;;  %v1129_v28 = vpop.f32.mrb[23].mxu1 }
0x12ed   :  { %v1004_v29 = vmul.f32 -1.442695, %v762_v27 }
0x12ef   :  { %1192 = vpow2.f32 %v1004_v29 }
0x12f9   :  { %v1193_v30 = vpop.eup %1192 }
0x12fa   :  { %v766_v31 = vadd.f32 1.0, %v1193_v30 }
0x12fc   :  { %1194 = vrcp.f32 %v766_v31 }
0x1306   :  { %v1195_v32 = vpop.eup %1194 }
0x1307   :  { %v769_v33 = vmul.f32 2.0, %v1195_v32  ;;  %v774_v37 = vmul.f32 %v1195_v32, %v772_v36 }
0x1309   :  { %v1005_v19 = vadd.f32 -1.0, %v769_v33 }
0x130b   :  { %776 = vrot.lane.b32.xlu0 %v1005_v19, %s1273_s1 }
0x137d   :  { %v777_v34 = vpop.permute.xlu0 %776 }
0x137e   :  { %v779_v35 = vmul.f32 %v1195_v32, %v777_v34 }
0x1380   :  { %781 = vrot.lane.b32.xlu1 %v779_v35, %s1274_s24 }
0x13f2   :  { %v782_v38 = vpop.permute.xlu1 %781 }
0x13f3   :  { %v784_v40 = vadd.f32 %v782_v38, %v774_v37 }
0x13f5   :  { %1196 = vtanh.f32 %v784_v40  ;;  %v852_v0 = vrot.slane %v784_v40, 7 }
0x13ff   :  { %v1197_v41 = vpop.eup %1196 }
0x1400   :  { %787 = vrot.lane.b32.xlu0 %v1197_v41, %s1273_s1 }
0x1472   :  { %v788_v42 = vpop.permute.xlu0 %787 }
0x1473   :  { %v790_v43 = vmul.f32 %v1195_v32, %v788_v42 }
0x1475   :  { %v791_v45 = vpack.c.bf16 %v790_v43, %v790_v43  ;;  %v872_v46 = vsel %vm65_vm4, %v871_v44, %v790_v43 }
0x1477   :  { %v793_v47 = vrot.slane %v791_v45, 1 }
0x1479   :  { %794 = vrot.lane.b32.xlu1 %v793_v47, %s1274_s24 }
0x14eb   :  { %v795_v49 = vpop.permute.xlu1 %794 }
0x14ec   :  { %1135 = vmatmul.mubr.msk.bf16.vlgmr.msra.gmra.mrb[16].mxu0 %vm188_vm10, %v795_v49 }
0x15bf   :  { %v833_v50 = vpop.f32.mrb[16].mxu0 }
0x15c0   :  { %v840_v51 = vrot.slane %v833_v50, 5  ;;  %v1136_v52 = vpop.f32.mrb[17].mxu0 }
0x15c1   :  { %v836_v53 = vpop.f32.mrb[18].mxu0 }
0x15c2   :  { %v842_v54 = vadd.f32 %v840_v51, %v1446_v39  ;;  %v1137_v55 = vpop.f32.mrb[19].mxu0  ;;  %v874_v39 = vld [vmem:[#allocation6 + $0x80] sm:$0xff] }
0x15c3   :  { %v878_v7 = vpack.c.bf16 %v875_v5, %v874_v39 }
0x15c4   :  { %v1007_v56 = vmul.f32 -1.442695, %v842_v54 }
0x15c5   :  { %1139 = vmatpush3.bf16.msra.mxu1 %v878_v7 }
0x15c6   :  { %1198 = vpow2.f32 %v1007_v56  ;;  %1140 = vmatprep.subr.bf16.mxu1 %v1270_v4 }
0x15c9   :  { %1141 = vmatpush3.bf16.msra.mxu1 %v879_v9 }
0x15d0   :  { %v1199_v57 = vpop.eup %1198 }
0x15d1   :  { %v846_v58 = vadd.f32 1.0, %v1199_v57 }
0x15d3   :  { %1200 = vrcp.f32 %v846_v58 }
0x15dd   :  { %v1201_v59 = vpop.eup %1200 }
0x15de   :  { %v849_v60 = vmul.f32 2.0, %v1201_v59  ;;  %v854_v1 = vmul.f32 %v1201_v59, %v852_v0 }
0x15e0   :  { %v1008_v61 = vadd.f32 -1.0, %v849_v60 }
0x15e2   :  { %856 = vrot.lane.b32.xlu0 %v1008_v61, %s1273_s1 }
0x1654   :  { %v857_v62 = vpop.permute.xlu0 %856 }
0x1655   :  { %v859_v63 = vmul.f32 %v1201_v59, %v857_v62 }
0x1657   :  { %861 = vrot.lane.b32.xlu1 %v859_v63, %s1274_s24 }
0x16c9   :  { %v862_v2 = vpop.permute.xlu1 %861 }
0x16ca   :  { %v864_v3 = vadd.f32 %v862_v2, %v854_v1 }
0x16cc   :  { %1202 = vtanh.f32 %v864_v3 }
0x16d6   :  { %v1203_v11 = vpop.eup %1202 }
0x16d7   :  { %867 = vrot.lane.b32.xlu0 %v1203_v11, %s1273_s1 }
0x1749   :  { %v868_v12 = vpop.permute.xlu0 %867 }
0x174a   :  { %v870_v13 = vmul.f32 %v1201_v59, %v868_v12 }
0x174c   :  { %v873_v14 = vsel %vm67_vm6, %v872_v46, %v870_v13 }
0x174d   :  { %v881_v15 = vpack.c.bf16 %v873_v14, %v873_v14 }
0x174f   :  { %887 = vrot.lane.b32.xlu1 %v881_v15, %s1274_s24 }
0x17c1   :  { %v888_v48 = vpop.permute.xlu1 %887 }
0x17c2   :  { %1143 = vmatmul.mubr.msk.bf16.vlgmr.msra.gmra.mrb[24].mxu1 %vm188_vm10, %v888_v48 }
0x1895   :  { %v926_v17 = vpop.f32.mrb[24].mxu1 }
0x1896   :  { %v927_v18 = vadd.f32 %v1009_v16, %v926_v17  ;;  %v1144_v20 = vpop.f32.mrb[25].mxu1 }
0x1897   :  { %v929_v21 = vpop.f32.mrb[26].mxu1 }
0x1898   :  { %v933_v4 = vmul.f32 0.1, %v927_v18  ;;  %v1145_v22 = vpop.f32.mrb[27].mxu1  ;;  %vm932_vm11 = vcmp.ge.f32.partialorder %v927_v18, 0.0 }
0x189a   :  { %v934_v23 = vsel %vm932_vm11, %v927_v18, %v933_v4 }
0x189b   :  { %v937_v24 = vsel %vm935_vm12, %v934_v23, -inf  ;;  %936 = vst.msk [vmem:[#allocation7] sm:$0xf] %vm935_vm12, %v934_v23 }
0x189c   :  { %938 = vmax.xlane.f32.xlu0 %v937_v24 }
0x1929   :  { %v939_v25 = vpop.xlane.xlu0 %938 }
0x192a   :  { %vm940_vm13 = vcmp.eq.f32.partialorder %v934_v23, %v939_v25 }
0x192b   :  { %v941_v26 = vsel %vm940_vm13, %v1336_v10, 8 }
0x192c   :  { %v942_v27 = vsel %vm935_vm12, %v941_v26, 2147483647 }
0x192d   :  { %v944_v28 = vshra.s32 %v942_v27, 16  ;;  %v943_v30 = vand.u32 65535, %v942_v27 }
0x192f   :  { %v946_v29 = vcvt.s32.f32 %v944_v28  ;;  %v945_v32 = vcvt.s32.f32 %v943_v30 }
0x1931   :  { %947 = vmin.xlane.f32.xlu1 %v946_v29 }
0x19be   :  { %v948_v31 = vpop.xlane.xlu1 %947 }
0x19bf   :  { %vm949_vm14 = vcmp.eq.f32.partialorder %v946_v29, %v948_v31 }
0x19c0   :  { %v950_v33 = vsel %vm949_vm14, %v945_v32, inf }
0x19c1   :  { %951 = vmin.xlane.f32.xlu0 %v950_v33 }
0x19c2   :  { %1249 = shalt.err (!%p1246_p3)
}
0x19c3   :  { %s1250_s29 = scalar_lea.hbm %s1507_s3, 64 }
0x19c4   :  { %p1251_p4 = scmp.ne.s32.totalorder %s1507_s3, %s1250_s29  ;;  %p1254_p5 = scmp.lt.u32.totalorder %s1250_s29, %s1507_s3 }
0x19c6   :  { %p1256_p6 = pnand %p1254_p5, %p1251_p4 }
0x19c8   :  { %1259 = shalt.err (!%p1256_p6)
}
0x19c9   :  { %968 = dma.vmem_to_hbm [thread:$0]  %s966_s26, 64, %s1507_s3, [#allocation4]   ;;  %v954_v10 = vcvt.f32.s32 %v948_v31  ;;  %vm957_vm15 = vcmask 3072  }
0x19cb   :  { %v955_v34 = vshll.u32 %v954_v10, 16 }
0x1a4e   :  { %v952_v19 = vpop.xlane.xlu0 %951 }
0x1a4f   :  { %v953_v35 = vcvt.f32.s32 %v952_v19 }
0x1a51   :  { %v956_v36 = vadd.s32 %v955_v34, %v953_v35 }
0x1a53   :  { %958 = vst.msk [vmem:[%s1508_s4] sm:$0xf] %vm957_vm15, %v956_v36 }
0x1a54   :  { %1264 = dma.done.wait [#allocation4], 64  }
0x1a55   :  { %1265 = vsyncadd [#allocation4], 4294967232 }
0x1a56   :  { %976 = vsyncpa [#allocation3], 1 }
0x1a57   :  { %977 = vsyncpa [#allocation4], 1 }
0x1a58   :  { %978 = vsyncpa [#allocation5], 1 }

</bundles_post_ra>
